<compile_context>
chip_gen: v7x
topology: tpu7x:2x2x1
jax: 0.10.0
libtpu: 0.0.40
codegen_flags: <defaults>
</compile_context>

<pallas_src>
import functools

import jax
import jax.numpy as jnp
from jax import lax
from jax.experimental import pallas as pl
from jax.experimental.pallas import tpu as pltpu

_LANE = 128
_SUB = 32   # sublane granule satisfying f32 (8), bf16 (16) and int8 (32) tiling


def _round_up(x, m):
    return ((x + m - 1) // m) * m


def _dice_ce_kernel(pred_ref, lab_ref, ce_ref, inter_ref, tsum_ref, psum_ref,
                    *, num_ch, tile_s, num_valid, needs_mask):
    t = pl.program_id(1)

    # Per-batch accumulators: zero them on the first voxel tile of each batch.
    @pl.when(t == 0)
    def _():
        ce_ref[...] = jnp.zeros_like(ce_ref)
        inter_ref[...] = jnp.zeros_like(inter_ref)
        tsum_ref[...] = jnp.zeros_like(tsum_ref)
        psum_ref[...] = jnp.zeros_like(psum_ref)

    # Per-channel logit planes, voxels lane-dense: each (tile_s, 128) f32.
    x = [pred_ref[0, c].astype(jnp.float32) for c in range(num_ch)]
    lab = lab_ref[0].astype(jnp.int32)                      # (tile_s, 128)

    # Channel softmax statistics, fully unrolled elementwise (VPU only;
    # the channel axis is a static Python loop, no cross-lane reductions).
    m = x[0]
    for c in range(1, num_ch):
        m = jnp.maximum(m, x[c])
    e = [jnp.exp(xc - m) for xc in x]
    s = e[0]
    for c in range(1, num_ch):
        s = s + e[c]
    inv_s = pl.reciprocal(s, approx=True)

    # One-hot planes per channel (needed for CE's true-class logit + dice).
    onehot = [(lab == c).astype(jnp.float32) for c in range(num_ch)]

    # Cross-entropy per voxel: logsumexp - logit[true class].
    lse = m + jnp.log(s)
    logit_true = onehot[0] * x[0]
    for c in range(1, num_ch):
        logit_true = logit_true + onehot[c] * x[c]
    ce_vox = lse - logit_true

    # Mask padded voxels (only compiled in when the volume was padded).
    if needs_mask:
        row = lax.broadcasted_iota(jnp.int32, (tile_s, _LANE), 0)
        col = lax.broadcasted_iota(jnp.int32, (tile_s, _LANE), 1)
        vidx = (t * tile_s + row) * _LANE + col
        valid = (vidx < num_valid).astype(jnp.float32)
        ce_vox = ce_vox * valid
    else:
        valid = None

    ce_ref[0] = ce_ref[0] + jnp.sum(ce_vox, keepdims=True)

    # Foreground-only (include_background=False) Dice partial reductions.
    fg = num_ch - 1
    lane_sel = lax.broadcasted_iota(jnp.int32, (1, fg), 1)
    inter_row = jnp.zeros((1, fg), jnp.float32)
    tsum_row = jnp.zeros((1, fg), jnp.float32)
    psum_row = jnp.zeros((1, fg), jnp.float32)
    for c in range(1, num_ch):
        sel = (lane_sel == (c - 1)).astype(jnp.float32)     # (1, fg) one-hot col
        p_c = e[c] * inv_s                                  # softmax prob, ch c
        inter_row = inter_row + jnp.sum(onehot[c] * p_c, keepdims=True) * sel
        tsum_row = tsum_row + jnp.sum(onehot[c], keepdims=True) * sel
        if valid is not None:
            p_c = p_c * valid                               # padded labels are 0,
        psum_row = psum_row + jnp.sum(p_c, keepdims=True) * sel  # only psum needs mask

    inter_ref[0] = inter_ref[0] + inter_row
    tsum_ref[0] = tsum_ref[0] + tsum_row
    psum_ref[0] = psum_ref[0] + psum_row


@functools.partial(jax.jit, static_argnames=("tile_v",))
def dice_ce_loss(y_pred, y_true, tile_v=65536):
    """DiceCELoss(to_onehot_y=True, use_softmax=True, layout='NCDHW',
    include_background=False).forward(y_pred, y_true).

    y_pred: (N, C, D, H, W) logits (float32 or bfloat16)
    y_true: (N, 1, D, H, W) integer labels in [0, C)
    """
    N, C, D, H, W = y_pred.shape
    V = D * H * W
    fg = C - 1

    rows = _round_up(V, _LANE) // _LANE                      # 128-voxel rows
    tile_s = _round_up(max(_SUB, tile_v // _LANE), _SUB)
    tile_s = min(tile_s, _round_up(rows, _SUB))              # clamp to volume
    rows_pad = _round_up(rows, tile_s)
    V_pad = rows_pad * _LANE
    n_tiles = rows_pad // tile_s
    needs_mask = V_pad != V

    # Native NCV layout: pure reshape, voxels stay contiguous and lane-dense.
    pred = y_pred.reshape(N, C, V)
    if pred.dtype not in (jnp.float32, jnp.bfloat16):
        pred = pred.astype(jnp.float32)
    lab = y_true.reshape(N, V).astype(jnp.int8)              # classes < 128
    if needs_mask:
        pred = jnp.pad(pred, ((0, 0), (0, 0), (0, V_pad - V)))
        lab = jnp.pad(lab, ((0, 0), (0, V_pad - V)))
    pred = pred.reshape(N, C, rows_pad, _LANE)
    lab = lab.reshape(N, rows_pad, _LANE)

    kernel = functools.partial(
        _dice_ce_kernel, num_ch=C, tile_s=tile_s, num_valid=V,
        needs_mask=needs_mask)

    out_shapes = (
        jax.ShapeDtypeStruct((N, 1, 1), jnp.float32),    # per-batch CE sum
        jax.ShapeDtypeStruct((N, 1, fg), jnp.float32),   # intersection  (n, fg)
        jax.ShapeDtypeStruct((N, 1, fg), jnp.float32),   # target_sum    (n, fg)
        jax.ShapeDtypeStruct((N, 1, fg), jnp.float32),   # prediction_sum(n, fg)
    )

    ce_sum, inter, tsum, psum = pl.pallas_call(
        kernel,
        out_shape=out_shapes,
        grid=(N, n_tiles),
        in_specs=[
            pl.BlockSpec((1, C, tile_s, _LANE), lambda n, t: (n, 0, t, 0)),
            pl.BlockSpec((1, tile_s, _LANE), lambda n, t: (n, t, 0)),
        ],
        out_specs=(
            pl.BlockSpec((1, 1, 1), lambda n, t: (n, 0, 0)),
            pl.BlockSpec((1, 1, fg), lambda n, t: (n, 0, 0)),
            pl.BlockSpec((1, 1, fg), lambda n, t: (n, 0, 0)),
            pl.BlockSpec((1, 1, fg), lambda n, t: (n, 0, 0)),
        ),
        compiler_params=pltpu.CompilerParams(
            dimension_semantics=("parallel", "arbitrary")),
    )(pred, lab)

    # Cheap scalar glue.
    smooth_nr = 1e-06
    smooth_dr = 1e-06
    cross_entropy = jnp.sum(ce_sum) / (N * V)                # CE mean over voxels
    dice_score = (2.0 * inter + smooth_nr) / (tsum + psum + smooth_dr)
    dice = jnp.mean(1.0 - dice_score)
    return (dice + cross_entropy) / 2.0


def _reference_loss(y_pred, y_true):
    """Pure-JAX reference mirroring the PyTorch module (for sanity checking)."""
    N, C = y_pred.shape[:2]
    yp = y_pred.astype(jnp.float32)
    labels = y_true[:, 0].astype(jnp.int32)                  # (N, D, H, W)
    lse = jax.nn.logsumexp(yp, axis=1)
    true_logit = jnp.take_along_axis(yp, labels[:, None], axis=1)[:, 0]
    ce = jnp.mean(lse - true_logit)
    probs = jax.nn.softmax(yp, axis=1)
    onehot = jax.nn.one_hot(labels, C, axis=1, dtype=jnp.float32)
    tgt, pr = onehot[:, 1:], probs[:, 1:]
    red = (2, 3, 4)
    inter = jnp.sum(tgt * pr, axis=red)
    tsum = jnp.sum(tgt, axis=red)
    psum = jnp.sum(pr, axis=red)
    dsc = (2.0 * inter + 1e-06) / (tsum + psum + 1e-06)
    dice = jnp.mean(1.0 - dsc)
    return (dice + ce) / 2.0


if __name__ == "__main__":
    key = jax.random.PRNGKey(0)

    # num_classes = 3 as implied by the reference module's to_one_hot.
    test_cases = [
        ((2, 3, 8, 8, 8), 65536),     # padded tail (mask path), single tile
        ((2, 3, 16, 16, 32), 4096),   # multi-tile accumulation, no padding
        ((1, 3, 8, 16, 20), 65536),   # odd volume, padded tail
    ]
    for shape, tile_v in test_cases:
        key, k_pred, k_lab = jax.random.split(key, 3)
        N, C = shape[:2]
        y_pred = jax.random.normal(k_pred, shape, dtype=jnp.float32)
        y_true = jax.random.randint(k_lab, (N, 1) + shape[2:], 0, C,
                                    dtype=jnp.int32)
        loss = jax.block_until_ready(dice_ce_loss(y_pred, y_true, tile_v=tile_v))
        ref = jax.block_until_ready(_reference_loss(y_pred, y_true))
        # Tolerance accounts for pl.reciprocal(approx=True) in the softmax.
        assert jnp.allclose(loss, ref, rtol=1e-2, atol=1e-3), (shape, loss, ref)

    print("KERNEL_OK")
</pallas_src>

<mosaic_0001>
module attributes {stable_mosaic.version = 11 : i64} {
  func.func @_dice_ce_kernel(%arg0: i32, %arg1: i32, %arg2: memref<1x3x32x128xf32, #tpu.memory_space<vmem>>, %arg3: memref<1x32x128xi8, #tpu.memory_space<vmem>>, %arg4: memref<1x1x1xf32, #tpu.memory_space<vmem>>, %arg5: memref<1x1x2xf32, #tpu.memory_space<vmem>>, %arg6: memref<1x1x2xf32, #tpu.memory_space<vmem>>, %arg7: memref<1x1x2xf32, #tpu.memory_space<vmem>>) attributes {dimension_semantics = [#tpu.dimension_semantics<parallel>, #tpu.dimension_semantics<arbitrary>], iteration_bounds = array<i64: 2, 1>, scalar_prefetch = 0 : i64, scratch_operands = 0 : i64, tpu.core_type = #tpu.core_type<tc>, window_params = [{transform_indices = @transform_0, window_bounds = array<i64: 1, 3, 32, 128>}, {transform_indices = @transform_1, window_bounds = array<i64: 1, 32, 128>}, {transform_indices = @transform_2, window_bounds = array<i64: 1, 1, 1>}, {transform_indices = @transform_3, window_bounds = array<i64: 1, 1, 2>}, {transform_indices = @transform_4, window_bounds = array<i64: 1, 1, 2>}, {transform_indices = @transform_5, window_bounds = array<i64: 1, 1, 2>}]} {
    %c0_i32 = arith.constant 0 : i32
    %0 = arith.cmpi eq, %arg1, %c0_i32 : i32
    %1 = arith.extui %0 : i1 to i32
    %c0_i32_0 = arith.constant 0 : i32
    %2 = arith.cmpi ne, %1, %c0_i32_0 : i32
    scf.if %2 {
      %cst_49 = arith.constant 0.000000e+00 : f32
      %151 = vector.broadcast %cst_49 : f32 to vector<1x1x1xf32>
      %c0_50 = arith.constant 0 : index
      %c0_51 = arith.constant 0 : index
      %c0_52 = arith.constant 0 : index
      %152 = vector.load %arg4[%c0_50, %c0_51, %c0_52] : memref<1x1x1xf32, #tpu.memory_space<vmem>>, vector<1x1x1xf32>
      tpu.vector_store %arg4[%c0_50, %c0_51, %c0_52], %151 {strides = array<i32>} : memref<1x1x1xf32, #tpu.memory_space<vmem>>, vector<1x1x1xf32>,
      %cst_53 = arith.constant 0.000000e+00 : f32
      %153 = vector.broadcast %cst_53 : f32 to vector<1x1x2xf32>
      %c0_54 = arith.constant 0 : index
      %c0_55 = arith.constant 0 : index
      %c0_56 = arith.constant 0 : index
      %154 = vector.load %arg5[%c0_54, %c0_55, %c0_56] : memref<1x1x2xf32, #tpu.memory_space<vmem>>, vector<1x1x2xf32>
      tpu.vector_store %arg5[%c0_54, %c0_55, %c0_56], %153 {strides = array<i32>} : memref<1x1x2xf32, #tpu.memory_space<vmem>>, vector<1x1x2xf32>,
      %cst_57 = arith.constant 0.000000e+00 : f32
      %155 = vector.broadcast %cst_57 : f32 to vector<1x1x2xf32>
      %c0_58 = arith.constant 0 : index
      %c0_59 = arith.constant 0 : index
      %c0_60 = arith.constant 0 : index
      %156 = vector.load %arg6[%c0_58, %c0_59, %c0_60] : memref<1x1x2xf32, #tpu.memory_space<vmem>>, vector<1x1x2xf32>
      tpu.vector_store %arg6[%c0_58, %c0_59, %c0_60], %155 {strides = array<i32>} : memref<1x1x2xf32, #tpu.memory_space<vmem>>, vector<1x1x2xf32>,
      %cst_61 = arith.constant 0.000000e+00 : f32
      %157 = vector.broadcast %cst_61 : f32 to vector<1x1x2xf32>
      %c0_62 = arith.constant 0 : index
      %c0_63 = arith.constant 0 : index
      %c0_64 = arith.constant 0 : index
      %158 = vector.load %arg7[%c0_62, %c0_63, %c0_64] : memref<1x1x2xf32, #tpu.memory_space<vmem>>, vector<1x1x2xf32>
      tpu.vector_store %arg7[%c0_62, %c0_63, %c0_64], %157 {strides = array<i32>} : memref<1x1x2xf32, #tpu.memory_space<vmem>>, vector<1x1x2xf32>,
    } else {
    }
    %c0 = arith.constant 0 : index
    %c0_1 = arith.constant 0 : index
    %c0_2 = arith.constant 0 : index
    %c0_3 = arith.constant 0 : index
    %3 = vector.load %arg2[%c0, %c0_1, %c0_2, %c0_3] : memref<1x3x32x128xf32, #tpu.memory_space<vmem>>, vector<1x1x32x128xf32>
    %4 = vector.shape_cast %3 : vector<1x1x32x128xf32> to vector<32x128xf32>
    %c0_4 = arith.constant 0 : index
    %c1 = arith.constant 1 : index
    %c0_5 = arith.constant 0 : index
    %c0_6 = arith.constant 0 : index
    %5 = vector.load %arg2[%c0_4, %c1, %c0_5, %c0_6] : memref<1x3x32x128xf32, #tpu.memory_space<vmem>>, vector<1x1x32x128xf32>
    %6 = vector.shape_cast %5 : vector<1x1x32x128xf32> to vector<32x128xf32>
    %c0_7 = arith.constant 0 : index
    %c2 = arith.constant 2 : index
    %c0_8 = arith.constant 0 : index
    %c0_9 = arith.constant 0 : index
    %7 = vector.load %arg2[%c0_7, %c2, %c0_8, %c0_9] : memref<1x3x32x128xf32, #tpu.memory_space<vmem>>, vector<1x1x32x128xf32>
    %8 = vector.shape_cast %7 : vector<1x1x32x128xf32> to vector<32x128xf32>
    %c0_10 = arith.constant 0 : index
    %c0_11 = arith.constant 0 : index
    %c0_12 = arith.constant 0 : index
    %9 = vector.load %arg3[%c0_10, %c0_11, %c0_12] : memref<1x32x128xi8, #tpu.memory_space<vmem>>, vector<1x32x128xi8>
    %10 = vector.shape_cast %9 : vector<1x32x128xi8> to vector<32x128xi8>
    %11 = arith.extsi %10 : vector<32x128xi8> to vector<32x128xi32>
    %12 = arith.maximumf %4, %6 : vector<32x128xf32>
    %13 = arith.maximumf %12, %8 : vector<32x128xf32>
    %14 = arith.subf %4, %13 : vector<32x128xf32>
    %15 = math.exp %14 : vector<32x128xf32>
    %16 = arith.subf %6, %13 : vector<32x128xf32>
    %17 = math.exp %16 : vector<32x128xf32>
    %18 = arith.subf %8, %13 : vector<32x128xf32>
    %19 = math.exp %18 : vector<32x128xf32>
    %20 = arith.addf %15, %17 : vector<32x128xf32>
    %21 = arith.addf %20, %19 : vector<32x128xf32>
    %22 = tpu.reciprocal %21 {approx = true} : vector<32x128xf32> -> vector<32x128xf32>
    %c0_i32_13 = arith.constant 0 : i32
    %23 = vector.broadcast %c0_i32_13 : i32 to vector<32x128xi32>
    %24 = arith.cmpi eq, %11, %23 : vector<32x128xi32>
    %25 = arith.extui %24 : vector<32x128xi1> to vector<32x128xi32>
    %26 = arith.sitofp %25 : vector<32x128xi32> to vector<32x128xf32>
    %c1_i32 = arith.constant 1 : i32
    %27 = vector.broadcast %c1_i32 : i32 to vector<32x128xi32>
    %28 = arith.cmpi eq, %11, %27 : vector<32x128xi32>
    %29 = arith.extui %28 : vector<32x128xi1> to vector<32x128xi32>
    %30 = arith.sitofp %29 : vector<32x128xi32> to vector<32x128xf32>
    %c2_i32 = arith.constant 2 : i32
    %31 = vector.broadcast %c2_i32 : i32 to vector<32x128xi32>
    %32 = arith.cmpi eq, %11, %31 : vector<32x128xi32>
    %33 = arith.extui %32 : vector<32x128xi1> to vector<32x128xi32>
    %34 = arith.sitofp %33 : vector<32x128xi32> to vector<32x128xf32>
    %35 = math.log %21 : vector<32x128xf32>
    %36 = arith.addf %13, %35 : vector<32x128xf32>
    %37 = arith.mulf %26, %4 : vector<32x128xf32>
    %38 = arith.mulf %30, %6 : vector<32x128xf32>
    %39 = arith.addf %37, %38 : vector<32x128xf32>
    %40 = arith.mulf %34, %8 : vector<32x128xf32>
    %41 = arith.addf %39, %40 : vector<32x128xf32>
    %42 = arith.subf %36, %41 : vector<32x128xf32>
    %43 = tpu.iota {dimensions = array<i32: 0>} : vector<32x128xi32>
    %44 = tpu.iota {dimensions = array<i32: 1>} : vector<32x128xi32>
    %c32_i32 = arith.constant 32 : i32
    %45 = arith.muli %arg1, %c32_i32 : i32
    %46 = vector.broadcast %45 : i32 to vector<32x128xi32>
    %47 = arith.addi %46, %43 : vector<32x128xi32>
    %c128_i32 = arith.constant 128 : i32
    %48 = vector.broadcast %c128_i32 : i32 to vector<32x128xi32>
    %49 = arith.muli %47, %48 : vector<32x128xi32>
    %50 = arith.addi %49, %44 : vector<32x128xi32>
    %c512_i32 = arith.constant 512 : i32
    %51 = vector.broadcast %c512_i32 : i32 to vector<32x128xi32>
    %52 = arith.cmpi slt, %50, %51 : vector<32x128xi32>
    %53 = arith.extui %52 : vector<32x128xi1> to vector<32x128xi32>
    %54 = arith.sitofp %53 : vector<32x128xi32> to vector<32x128xf32>
    %55 = arith.mulf %42, %54 : vector<32x128xf32>
    %c0_14 = arith.constant 0 : index
    %c0_15 = arith.constant 0 : index
    %c0_16 = arith.constant 0 : index
    %56 = vector.load %arg4[%c0_14, %c0_15, %c0_16] : memref<1x1x1xf32, #tpu.memory_space<vmem>>, vector<1x1x1xf32>
    %57 = vector.shape_cast %56 : vector<1x1x1xf32> to vector<1x1xf32>
    %58 = vector.shape_cast %55 : vector<32x128xf32> to vector<1x32x128xf32>
    %cst = arith.constant dense<0.000000e+00> : vector<1xf32>
    %59 = vector.multi_reduction <add>, %58, %cst [1, 2] : vector<1x32x128xf32> to vector<1xf32>
    %60 = vector.shape_cast %59 : vector<1xf32> to vector<1x1x1xf32>
    %61 = vector.extract %60[0, 0, 0] : f32 from vector<1x1x1xf32>
    %62 = vector.broadcast %61 : f32 to vector<1x1xf32>
    %63 = arith.addf %57, %62 : vector<1x1xf32>
    %c0_17 = arith.constant 0 : index
    %c0_18 = arith.constant 0 : index
    %c0_19 = arith.constant 0 : index
    %64 = vector.load %arg4[%c0_17, %c0_18, %c0_19] : memref<1x1x1xf32, #tpu.memory_space<vmem>>, vector<1x1x1xf32>
    %65 = vector.shape_cast %64 : vector<1x1x1xf32> to vector<1x1xf32>
    %66 = vector.shape_cast %63 : vector<1x1xf32> to vector<1x1x1xf32>
    tpu.vector_store %arg4[%c0_17, %c0_18, %c0_19], %66 {strides = array<i32>} : memref<1x1x1xf32, #tpu.memory_space<vmem>>, vector<1x1x1xf32>,
    %67 = tpu.iota {dimensions = array<i32: 1>} : vector<1x2xi32>
    %cst_20 = arith.constant 0.000000e+00 : f32
    %68 = vector.broadcast %cst_20 : f32 to vector<1x2xf32>
    %cst_21 = arith.constant 0.000000e+00 : f32
    %69 = vector.broadcast %cst_21 : f32 to vector<1x2xf32>
    %cst_22 = arith.constant 0.000000e+00 : f32
    %70 = vector.broadcast %cst_22 : f32 to vector<1x2xf32>
    %c0_i32_23 = arith.constant 0 : i32
    %71 = vector.broadcast %c0_i32_23 : i32 to vector<1x2xi32>
    %72 = arith.cmpi eq, %67, %71 : vector<1x2xi32>
    %73 = arith.extui %72 : vector<1x2xi1> to vector<1x2xi32>
    %74 = arith.sitofp %73 : vector<1x2xi32> to vector<1x2xf32>
    %75 = arith.mulf %17, %22 : vector<32x128xf32>
    %76 = arith.mulf %30, %75 : vector<32x128xf32>
    %77 = vector.shape_cast %76 : vector<32x128xf32> to vector<1x32x128xf32>
    %cst_24 = arith.constant dense<0.000000e+00> : vector<1xf32>
    %78 = vector.multi_reduction <add>, %77, %cst_24 [1, 2] : vector<1x32x128xf32> to vector<1xf32>
    %79 = vector.shape_cast %78 : vector<1xf32> to vector<1x1x1xf32>
    %80 = vector.extract %79[0, 0, 0] : f32 from vector<1x1x1xf32>
    %81 = vector.broadcast %80 : f32 to vector<1x1xf32>
    %82 = vector.broadcast %81 : vector<1x1xf32> to vector<1x2xf32>
    %83 = arith.mulf %82, %74 : vector<1x2xf32>
    %84 = arith.addf %68, %83 : vector<1x2xf32>
    %85 = vector.shape_cast %30 : vector<32x128xf32> to vector<1x32x128xf32>
    %cst_25 = arith.constant dense<0.000000e+00> : vector<1xf32>
    %86 = vector.multi_reduction <add>, %85, %cst_25 [1, 2] : vector<1x32x128xf32> to vector<1xf32>
    %87 = vector.shape_cast %86 : vector<1xf32> to vector<1x1x1xf32>
    %88 = vector.extract %87[0, 0, 0] : f32 from vector<1x1x1xf32>
    %89 = vector.broadcast %88 : f32 to vector<1x1xf32>
    %90 = vector.broadcast %89 : vector<1x1xf32> to vector<1x2xf32>
    %91 = arith.mulf %90, %74 : vector<1x2xf32>
    %92 = arith.addf %69, %91 : vector<1x2xf32>
    %93 = arith.mulf %75, %54 : vector<32x128xf32>
    %94 = vector.shape_cast %93 : vector<32x128xf32> to vector<1x32x128xf32>
    %cst_26 = arith.constant dense<0.000000e+00> : vector<1xf32>
    %95 = vector.multi_reduction <add>, %94, %cst_26 [1, 2] : vector<1x32x128xf32> to vector<1xf32>
    %96 = vector.shape_cast %95 : vector<1xf32> to vector<1x1x1xf32>
    %97 = vector.extract %96[0, 0, 0] : f32 from vector<1x1x1xf32>
    %98 = vector.broadcast %97 : f32 to vector<1x1xf32>
    %99 = vector.broadcast %98 : vector<1x1xf32> to vector<1x2xf32>
    %100 = arith.mulf %99, %74 : vector<1x2xf32>
    %101 = arith.addf %70, %100 : vector<1x2xf32>
    %c1_i32_27 = arith.constant 1 : i32
    %102 = vector.broadcast %c1_i32_27 : i32 to vector<1x2xi32>
    %103 = arith.cmpi eq, %67, %102 : vector<1x2xi32>
    %104 = arith.extui %103 : vector<1x2xi1> to vector<1x2xi32>
    %105 = arith.sitofp %104 : vector<1x2xi32> to vector<1x2xf32>
    %106 = arith.mulf %19, %22 : vector<32x128xf32>
    %107 = arith.mulf %34, %106 : vector<32x128xf32>
    %108 = vector.shape_cast %107 : vector<32x128xf32> to vector<1x32x128xf32>
    %cst_28 = arith.constant dense<0.000000e+00> : vector<1xf32>
    %109 = vector.multi_reduction <add>, %108, %cst_28 [1, 2] : vector<1x32x128xf32> to vector<1xf32>
    %110 = vector.shape_cast %109 : vector<1xf32> to vector<1x1x1xf32>
    %111 = vector.extract %110[0, 0, 0] : f32 from vector<1x1x1xf32>
    %112 = vector.broadcast %111 : f32 to vector<1x1xf32>
    %113 = vector.broadcast %112 : vector<1x1xf32> to vector<1x2xf32>
    %114 = arith.mulf %113, %105 : vector<1x2xf32>
    %115 = arith.addf %84, %114 : vector<1x2xf32>
    %116 = vector.shape_cast %34 : vector<32x128xf32> to vector<1x32x128xf32>
    %cst_29 = arith.constant dense<0.000000e+00> : vector<1xf32>
    %117 = vector.multi_reduction <add>, %116, %cst_29 [1, 2] : vector<1x32x128xf32> to vector<1xf32>
    %118 = vector.shape_cast %117 : vector<1xf32> to vector<1x1x1xf32>
    %119 = vector.extract %118[0, 0, 0] : f32 from vector<1x1x1xf32>
    %120 = vector.broadcast %119 : f32 to vector<1x1xf32>
    %121 = vector.broadcast %120 : vector<1x1xf32> to vector<1x2xf32>
    %122 = arith.mulf %121, %105 : vector<1x2xf32>
    %123 = arith.addf %92, %122 : vector<1x2xf32>
    %124 = arith.mulf %106, %54 : vector<32x128xf32>
    %125 = vector.shape_cast %124 : vector<32x128xf32> to vector<1x32x128xf32>
    %cst_30 = arith.constant dense<0.000000e+00> : vector<1xf32>
    %126 = vector.multi_reduction <add>, %125, %cst_30 [1, 2] : vector<1x32x128xf32> to vector<1xf32>
    %127 = vector.shape_cast %126 : vector<1xf32> to vector<1x1x1xf32>
    %128 = vector.extract %127[0, 0, 0] : f32 from vector<1x1x1xf32>
    %129 = vector.broadcast %128 : f32 to vector<1x1xf32>
    %130 = vector.broadcast %129 : vector<1x1xf32> to vector<1x2xf32>
    %131 = arith.mulf %130, %105 : vector<1x2xf32>
    %132 = arith.addf %101, %131 : vector<1x2xf32>
    %c0_31 = arith.constant 0 : index
    %c0_32 = arith.constant 0 : index
    %c0_33 = arith.constant 0 : index
    %133 = vector.load %arg5[%c0_31, %c0_32, %c0_33] : memref<1x1x2xf32, #tpu.memory_space<vmem>>, vector<1x1x2xf32>
    %134 = vector.shape_cast %133 : vector<1x1x2xf32> to vector<1x2xf32>
    %135 = arith.addf %134, %115 : vector<1x2xf32>
    %c0_34 = arith.constant 0 : index
    %c0_35 = arith.constant 0 : index
    %c0_36 = arith.constant 0 : index
    %136 = vector.load %arg5[%c0_34, %c0_35, %c0_36] : memref<1x1x2xf32, #tpu.memory_space<vmem>>, vector<1x1x2xf32>
    %137 = vector.shape_cast %136 : vector<1x1x2xf32> to vector<1x2xf32>
    %138 = vector.shape_cast %135 : vector<1x2xf32> to vector<1x1x2xf32>
    tpu.vector_store %arg5[%c0_34, %c0_35, %c0_36], %138 {strides = array<i32>} : memref<1x1x2xf32, #tpu.memory_space<vmem>>, vector<1x1x2xf32>,
    %c0_37 = arith.constant 0 : index
    %c0_38 = arith.constant 0 : index
    %c0_39 = arith.constant 0 : index
    %139 = vector.load %arg6[%c0_37, %c0_38, %c0_39] : memref<1x1x2xf32, #tpu.memory_space<vmem>>, vector<1x1x2xf32>
    %140 = vector.shape_cast %139 : vector<1x1x2xf32> to vector<1x2xf32>
    %141 = arith.addf %140, %123 : vector<1x2xf32>
    %c0_40 = arith.constant 0 : index
    %c0_41 = arith.constant 0 : index
    %c0_42 = arith.constant 0 : index
    %142 = vector.load %arg6[%c0_40, %c0_41, %c0_42] : memref<1x1x2xf32, #tpu.memory_space<vmem>>, vector<1x1x2xf32>
    %143 = vector.shape_cast %142 : vector<1x1x2xf32> to vector<1x2xf32>
    %144 = vector.shape_cast %141 : vector<1x2xf32> to vector<1x1x2xf32>
    tpu.vector_store %arg6[%c0_40, %c0_41, %c0_42], %144 {strides = array<i32>} : memref<1x1x2xf32, #tpu.memory_space<vmem>>, vector<1x1x2xf32>,
    %c0_43 = arith.constant 0 : index
    %c0_44 = arith.constant 0 : index
    %c0_45 = arith.constant 0 : index
    %145 = vector.load %arg7[%c0_43, %c0_44, %c0_45] : memref<1x1x2xf32, #tpu.memory_space<vmem>>, vector<1x1x2xf32>
    %146 = vector.shape_cast %145 : vector<1x1x2xf32> to vector<1x2xf32>
    %147 = arith.addf %146, %132 : vector<1x2xf32>
    %c0_46 = arith.constant 0 : index
    %c0_47 = arith.constant 0 : index
    %c0_48 = arith.constant 0 : index
    %148 = vector.load %arg7[%c0_46, %c0_47, %c0_48] : memref<1x1x2xf32, #tpu.memory_space<vmem>>, vector<1x1x2xf32>
    %149 = vector.shape_cast %148 : vector<1x1x2xf32> to vector<1x2xf32>
    %150 = vector.shape_cast %147 : vector<1x2xf32> to vector<1x1x2xf32>
    tpu.vector_store %arg7[%c0_46, %c0_47, %c0_48], %150 {strides = array<i32>} : memref<1x1x2xf32, #tpu.memory_space<vmem>>, vector<1x1x2xf32>,
    return
  }
  func.func @transform_0(%arg0: i32, %arg1: i32) -> (i32, i32, i32, i32) {
    %c0_i32 = arith.constant 0 : i32
    %c0_i32_0 = arith.constant 0 : i32
    %c0_i32_1 = arith.constant 0 : i32
    return %arg0, %c0_i32, %arg1, %c0_i32_0 : i32, i32, i32, i32
  }
  func.func @transform_1(%arg0: i32, %arg1: i32) -> (i32, i32, i32) {
    %c0_i32 = arith.constant 0 : i32
    %c0_i32_0 = arith.constant 0 : i32
    return %arg0, %arg1, %c0_i32 : i32, i32, i32
  }
  func.func @transform_2(%arg0: i32, %arg1: i32) -> (i32, i32, i32) {
    %c0_i32 = arith.constant 0 : i32
    %c0_i32_0 = arith.constant 0 : i32
    %c0_i32_1 = arith.constant 0 : i32
    return %arg0, %c0_i32, %c0_i32_0 : i32, i32, i32
  }
  func.func @transform_3(%arg0: i32, %arg1: i32) -> (i32, i32, i32) {
    %c0_i32 = arith.constant 0 : i32
    %c0_i32_0 = arith.constant 0 : i32
    %c0_i32_1 = arith.constant 0 : i32
    return %arg0, %c0_i32, %c0_i32_0 : i32, i32, i32
  }
  func.func @transform_4(%arg0: i32, %arg1: i32) -> (i32, i32, i32) {
    %c0_i32 = arith.constant 0 : i32
    %c0_i32_0 = arith.constant 0 : i32
    %c0_i32_1 = arith.constant 0 : i32
    return %arg0, %c0_i32, %c0_i32_0 : i32, i32, i32
  }
  func.func @transform_5(%arg0: i32, %arg1: i32) -> (i32, i32, i32) {
    %c0_i32 = arith.constant 0 : i32
    %c0_i32_0 = arith.constant 0 : i32
    %c0_i32_1 = arith.constant 0 : i32
    return %arg0, %c0_i32, %c0_i32_0 : i32, i32, i32
  }
}

</mosaic_0001>

<bundles_post_ra>
// kernel: dice_ce_loss.1
= control target key start
LH: loop header
LB: loop body
LE: loop exit
PB: predicated region body
PF: predicated region fallthrough
CT: control target
= control target key end

     0   :  { %s964_s18 = smov 0   ;;  %s966_s19 = smov 0   ;;  %s1237_s0 = inlined_call_operand.vmem [shape: f32[2,3,32,128], index: 0, kind: input, shape index: {}]   ;;  %s1238_s1 = inlined_call_operand.vmem [shape: s8[2,32,128], index: 1, kind: input, shape index: {}]   ;;  %s1239_s2 = inlined_call_operand.vmem [shape: f32[2,1,1], index: 2, kind: output, shape index: {0}]   ;;  %s1240_s3 = inlined_call_operand.vmem [shape: f32[2,1,2], index: 3, kind: output, shape index: {1}]   ;;  %s1241_s4 = inlined_call_operand.vmem [shape: f32[2,1,2], index: 4, kind: output, shape index: {2}]   ;;  %s1242_s5 = inlined_call_operand.vmem [shape: f32[2,1,2], index: 5, kind: output, shape index: {3}]  }
   0x1   :  { %s968_s20 = smov 0  }
   0x2 LB: > { %s28_s21 = sadd.s32 1, %s927_s19  ;;  %p798_p0 = scmp.ge.s32.totalorder %s931_s20, 1  ;;  %s931_s20 = sphi %s968_s20, %s16_s20   ;;  %s927_s19 = sphi %s966_s19, %s1244_s19   ;;  %s923_s18 = sphi %s964_s18, %s1243_s18  }
   0x3   : > { %p30_p1 = scmp.ge.s32.totalorder %s28_s21, 2  ;;  %p227_p2 = scmp.lt.s32.totalorder %s931_s20, 3 }
   0x5   : > { %s1246_s21 = smov (%p30_p1, %s28_s21), 0  ;;  %p228_p3 = pnand %p798_p0, %p227_p2 }
   0x6   : > { %p274_p4 = scmp.lt.s32.totalorder (!%p228_p3), %s923_s18, 1  ;;  %v933_v13 = vmov (!%p228_p3), 0.0   ;;  %v459_v51 = vlaneseq (!%p228_p3) }
   0x7   : > { %231 = sbr.rel (%p228_p3) target bundleno = 300 (0x12c), region = 28 }
   0x8   : > { %v460_v57 = vshrl.u32 (!%p228_p3), %v459_v51, 7  ;;  %v1088_v63 = vand.u32 (!%p228_p3), 127, %v459_v51 }
   0xa   : > { %v461_v60 = vadd.s32 (!%p228_p3), 8, %v460_v57  ;;  %v462_v62 = vadd.s32 (!%p228_p3), 16, %v460_v57 }
   0xe   : > { %s1248_s18 = smov (!%p274_p4, %s923_s18), 1 }
   0xf   : > { %s800_s22 = sshll.u32 %s1248_s18, 3  ;;  %s829_s23 = smul.u32 96, %s1248_s18 }
  0x10   : > { %s289_s26 = scalar_lea.vmem %s1238_s1, %s800_s22  ;;  %s1180_s7 = scalar_lea.vmem %s1239_s2, %s1248_s18 }
  0x11   : > { %v326_v0 = vld [vmem:[%s289_s26] sm:$0xff]  ;;  %s281_s29 = scalar_lea.vmem %s1237_s0, %s829_s23  ;;  %s1189_s10 = scalar_lea.vmem %s1240_s3, %s1248_s18 }
  0x12   : > { %v992_v1 = vunpack.c.0.s8 %v326_v0  ;;  %v994_v2 = vunpack.c.1.s8 %v326_v0  ;;  %v996_v3 = vunpack.c.2.s8 %v326_v0  ;;  %v998_v4 = vunpack.c.3.s8 %v326_v0  ;;  %v1000_v5 = vld [vmem:[%s281_s29] sm:$0xff]  ;;  %v1002_v6 = vld [vmem:[%s281_s29 + $0x8] sm:$0xff]  ;;  %v1005_v7 = vld [vmem:[%s281_s29 + $0x10] sm:$0xff]  ;;  %s1195_s13 = scalar_lea.vmem %s1241_s4, %s1248_s18  ;;  %s1207_s16 = scalar_lea.vmem %s1242_s5, %s1248_s18 }
  0x13   : > { %v1007_v8 = vld [vmem:[%s281_s29 + $0x18] sm:$0xff]  ;;  %v1009_v9 = vld [vmem:[%s281_s29 + $0x20] sm:$0xff]  ;;  %v1012_v10 = vld [vmem:[%s281_s29 + $0x28] sm:$0xff]  ;;  %v472_v0 = vmul.u32 128, %v460_v57 }
  0x14   : > { %vm399_vm0 = vcmp.eq.s32.totalorder %v992_v1, 1  ;;  %vm400_vm1 = vcmp.eq.s32.totalorder %v994_v2, 1  ;;  %v1014_v11 = vld [vmem:[%s281_s29 + $0x30] sm:$0xff]  ;;  %v1016_v12 = vld [vmem:[%s281_s29 + $0x38] sm:$0xff]  ;;  %vm401_vm2 = vcmp.eq.s32.totalorder %v996_v3, 1  ;;  %vm402_vm3 = vcmp.eq.s32.totalorder %v998_v4, 1 }
  0x15   : > { %v1021_v14 = vsel %vm399_vm0, 1.0, %v933_v13  ;;  %v1024_v15 = vsel %vm400_vm1, 1.0, %v933_v13  ;;  %v1026_v16 = vld [vmem:[%s281_s29 + $0x40] sm:$0xff]  ;;  %v1029_v17 = vsel %vm401_vm2, 1.0, %v933_v13  ;;  %v1033_v19 = vld [vmem:[%s281_s29 + $0x48] sm:$0xff]  ;;  %v1035_v20 = vld [vmem:[%s281_s29 + $0x50] sm:$0xff]  ;;  %v331_v22 = vmax.f32 %v1000_v5, %v1009_v9 }
  0x16   : > { %v539_v18 = vadd.f32 %v1024_v15, %v1021_v14  ;;  %v1037_v21 = vld [vmem:[%s281_s29 + $0x58] sm:$0xff]  ;;  %v1042_v23 = vsel %vm402_vm3, 1.0, %v933_v13  ;;  %v332_v24 = vmax.f32 %v1002_v6, %v1012_v10  ;;  %v333_v25 = vmax.f32 %v1005_v7, %v1014_v11 }
  0x17   : > { %v334_v26 = vmax.f32 %v1007_v8, %v1016_v12  ;;  %v1052_v28 = vmax.f32 %v331_v22, %v1026_v16  ;;  %vm388_vm4 = vcmp.eq.s32.totalorder %v994_v2, 0  ;;  %vm389_vm5 = vcmp.eq.s32.totalorder %v996_v3, 0 }
  0x18   : > { %v540_v27 = vadd.f32 %v1029_v17, %v539_v18  ;;  %v1055_v29 = vmax.f32 %v332_v24, %v1033_v19  ;;  %v1058_v30 = vmax.f32 %v333_v25, %v1035_v20  ;;  %v463_v24 = vadd.s32 24, %v460_v57 }
  0x19   : > { %v1061_v31 = vmax.f32 %v334_v26, %v1037_v21  ;;  %v339_v33 = vsub.f32 %v1000_v5, %v1052_v28  ;;  %v351_v34 = vsub.f32 %v1009_v9, %v1052_v28  ;;  %v363_v46 = vsub.f32 %v1026_v16, %v1052_v28 }
  0x1a   : > { %v541_v32 = vadd.f32 %v1042_v23, %v540_v27  ;;  %v340_v35 = vsub.f32 %v1002_v6, %v1055_v29  ;;  %v341_v36 = vsub.f32 %v1005_v7, %v1058_v30  ;;  %v352_v38 = vsub.f32 %v1012_v10, %v1055_v29 }
  0x1b   : > { %v342_v37 = vsub.f32 %v1007_v8, %v1061_v31  ;;  %v343_v39 = vmul.f32 1.442695, %v339_v33  ;;  %v353_v40 = vsub.f32 %v1014_v11, %v1058_v30  ;;  %v354_v44 = vsub.f32 %v1016_v12, %v1061_v31 }
  0x1c   : > { %542 = vadd.xlane.f32.xlu1 %v541_v32  ;;  %v345_v41 = vmul.f32 1.442695, %v340_v35  ;;  %v347_v42 = vmul.f32 1.442695, %v341_v36  ;;  %v355_v45 = vmul.f32 1.442695, %v351_v34  ;;  %v364_v48 = vsub.f32 %v1033_v19, %v1055_v29 }
  0x1d   : > { %v349_v43 = vmul.f32 1.442695, %v342_v37  ;;  %869 = vpow2.f32 %v343_v39  ;;  %v357_v47 = vmul.f32 1.442695, %v352_v38  ;;  %v359_v49 = vmul.f32 1.442695, %v353_v40 }
  0x1e   : > { %871 = vpow2.f32 %v345_v41  ;;  %v365_v50 = vsub.f32 %v1035_v20, %v1058_v30  ;;  %v361_v52 = vmul.f32 1.442695, %v354_v44  ;;  %v366_v53 = vsub.f32 %v1037_v21, %v1061_v31 }
  0x1f   : > { %873 = vpow2.f32 %v347_v42  ;;  %v367_v54 = vmul.f32 1.442695, %v363_v46  ;;  %v369_v55 = vmul.f32 1.442695, %v364_v48  ;;  %vm387_vm6 = vcmp.eq.s32.totalorder %v992_v1, 0 }
  0x20   : > { %875 = vpow2.f32 %v349_v43  ;;  %v371_v56 = vmul.f32 1.442695, %v365_v50  ;;  %v373_v58 = vmul.f32 1.442695, %v366_v53  ;;  %v473_v26 = vmul.u32 128, %v461_v60 }
  0x21   : > { %877 = vpow2.f32 %v355_v45  ;;  %v474_v33 = vmul.u32 128, %v462_v62  ;;  %v476_v34 = vadd.s32 %v472_v0, %v1088_v63  ;;  %vm390_vm7 = vcmp.eq.s32.totalorder %v998_v4, 0 }
  0x22   : > { %879 = vpow2.f32 %v357_v47  ;;  %v810_v38 = vsel %vm388_vm4, 1.0, %v933_v13  ;;  %v811_v39 = vsel %vm389_vm5, 1.0, %v933_v13  ;;  %v809_v40 = vsel %vm387_vm6, 1.0, %v933_v13 }
  0x23   : > { %881 = vpow2.f32 %v359_v49  ;;  %v475_v44 = vmul.u32 128, %v463_v24  ;;  %v477_v45 = vadd.s32 %v473_v26, %v1088_v63  ;;  %v812_v47 = vsel %vm390_vm7, 1.0, %v933_v13 }
  0x24   : > { %883 = vpow2.f32 %v361_v52  ;;  %v478_v49 = vadd.s32 %v474_v33, %v1088_v63  ;;  %vm480_vm8 = vcmp.lt.s32.totalorder %v476_v34, 512  ;;  %v435_v51 = vmul.f32 %v809_v40, %v1000_v5 }
  0x25   : > { %885 = vpow2.f32 %v367_v54  ;;  %v436_v52 = vmul.f32 %v810_v38, %v1002_v6  ;;  %v437_v53 = vmul.f32 %v811_v39, %v1005_v7  ;;  %vm411_vm9 = vcmp.eq.s32.totalorder %v992_v1, 2 }
  0x26   : > { %887 = vpow2.f32 %v369_v55  ;;  %vm412_vm10 = vcmp.eq.s32.totalorder %v994_v2, 2  ;;  %v440_v5 = vmul.f32 %v1024_v15, %v1012_v10  ;;  %vm413_vm11 = vcmp.eq.s32.totalorder %v996_v3, 2 }
  0x27   : > { %v870_v59 = vpop.eup %869  ;;  %889 = vpow2.f32 %v371_v56  ;;  %v439_v56 = vmul.f32 %v1021_v14, %v1009_v9  ;;  %vm414_vm12 = vcmp.eq.s32.totalorder %v998_v4, 2  ;;  %v441_v6 = vmul.f32 %v1029_v17, %v1014_v11 }
  0x28   : > { %v872_v61 = vpop.eup %871  ;;  %891 = vpow2.f32 %v373_v58  ;;  %v438_v58 = vmul.f32 %v812_v47, %v1007_v8  ;;  %v479_v1 = vadd.s32 %v475_v44, %v1088_v63  ;;  %v817_v7 = vsel %vm411_vm9, 1.0, %v933_v13 }
  0x29   : > { %v874_v18 = vpop.eup %873  ;;  %v442_v8 = vmul.f32 %v1042_v23, %v1016_v12  ;;  %v443_v2 = vadd.f32 %v439_v56, %v435_v51  ;;  %v818_v9 = vsel %vm412_vm10, 1.0, %v933_v13  ;;  %vm481_vm13 = vcmp.lt.s32.totalorder %v477_v45, 512 }
  0x2a   : > { %v876_v22 = vpop.eup %875  ;;  %v819_v3 = vsel %vm413_vm11, 1.0, %v933_v13  ;;  %v1134_v4 = vsel %vm414_vm12, 1.0, %v933_v13  ;;  %v444_v10 = vadd.f32 %v440_v5, %v436_v52  ;;  %vm482_vm14 = vcmp.lt.s32.totalorder %v478_v49, 512 }
  0x2b   : > { %v1090_v25 = vpop.eup %877  ;;  %v447_v11 = vmul.f32 %v817_v7, %v1026_v16  ;;  %vm483_vm15 = vcmp.lt.s32.totalorder %v479_v1, 512  ;;  %v448_v60 = vmul.f32 %v818_v9, %v1033_v19  ;;  %v599_v12 = vadd.f32 %v818_v9, %v817_v7 }
  0x2c   : > { %v1095_v27 = vpop.eup %879  ;;  %v375_v32 = vadd.f32 %v1090_v25, %v870_v59  ;;  %v446_v62 = vadd.f32 %v442_v8, %v438_v58  ;;  %v449_v0 = vmul.f32 %v819_v3, %v1035_v20  ;;  %v822_v16 = vsel %vm481_vm13, 1.0, %v933_v13 }
  0x2d   : > { %v1099_v35 = vpop.eup %881  ;;  %v376_v36 = vadd.f32 %v1095_v27, %v872_v61  ;;  %v445_v61 = vadd.f32 %v441_v6, %v437_v53  ;;  %v1148_v26 = vsel %vm482_vm14, 1.0, %v933_v13  ;;  %v1151_v19 = vsel %vm483_vm15, 1.0, %v933_v13 }
  0x2e   : > { %v1103_v37 = vpop.eup %883  ;;  %v377_v41 = vadd.f32 %v1099_v35, %v874_v18  ;;  %v450_v18 = vmul.f32 %v1134_v4, %v1037_v21  ;;  %v600_v21 = vadd.f32 %v819_v3, %v599_v12  ;;  %v452_v38 = vadd.f32 %v448_v60, %v444_v10 }
  0x2f   : > { %v886_v42 = vpop.eup %885  ;;  %v378_v43 = vadd.f32 %v1103_v37, %v876_v22  ;;  %v1143_v22 = vsel %vm480_vm8, 1.0, %v933_v13  ;;  %vm306_vm0 = vcmask 0   ;;  %vm308_vm1 = vcmask 8192  }
  0x30   : > { %v888_v46 = vpop.eup %887  ;;  %v379_v48 = vadd.f32 %v886_v42, %v375_v32  ;;  %v451_v32 = vadd.f32 %v447_v11, %v443_v2  ;;  %307 = vst.msk [vmem:[%s1180_s7] sm:$0x1] %vm306_vm0, %v933_v13  ;;  %vm513_vm2 = vcmp.eq.s32.totalorder %v1088_v63, 0  ;;  %vm573_vm3 = vcmp.eq.s32.totalorder %v1088_v63, 1 }
  0x31   : > { %v890_v50 = vpop.eup %889  ;;  %v380_v54 = vadd.f32 %v888_v46, %v376_v36  ;;  %309 = vst.msk [vmem:[%s1189_s10] sm:$0x1] %vm308_vm1, %v933_v13  ;;  %310 = vst.msk [vmem:[%s1195_s13] sm:$0x1] %vm308_vm1, %v933_v13 }
  0x32   : > { %v892_v55 = vpop.eup %891  ;;  %v381_v57 = vadd.f32 %v890_v50, %v377_v41  ;;  %893 = vrcp.f32 %v379_v48  ;;  %v453_v41 = vadd.f32 %v449_v0, %v445_v61  ;;  %v601_v61 = vadd.f32 %v1134_v4, %v600_v21  ;;  %311 = vst.msk [vmem:[%s1207_s16] sm:$0x1] %vm308_vm1, %v933_v13 }
  0x33   : > { %v382_v59 = vadd.f32 %v892_v55, %v378_v43  ;;  %895 = vrcp.f32 %v380_v54  ;;  %v454_v43 = vadd.f32 %v450_v18, %v446_v62 }
  0x34   : > { %897 = vrcp.f32 %v381_v57 }
  0x35   : > { %899 = vrcp.f32 %v382_v59 }
  0x36   : > { %901 = vlog2.f32 %v379_v48 }
  0x37   : > { %903 = vlog2.f32 %v380_v54 }
  0x38   : > { %905 = vlog2.f32 %v381_v57 }
  0x39   : > { %907 = vlog2.f32 %v382_v59 }
  0x3c   : > { %v894_v24 = vpop.eup %893 }
  0x3d   : > { %v896_v33 = vpop.eup %895  ;;  %v516_v20 = vmul.f32 %v894_v24, %v1090_v25  ;;  %v576_v36 = vmul.f32 %v894_v24, %v886_v42 }
  0x3e   : > { %v898_v34 = vpop.eup %897  ;;  %v517_v39 = vmul.f32 %v896_v33, %v1095_v27  ;;  %v577_v40 = vmul.f32 %v896_v33, %v888_v46 }
  0x3f   : > { %v900_v44 = vpop.eup %899  ;;  %v518_v45 = vmul.f32 %v898_v34, %v1099_v35  ;;  %v520_v47 = vmul.f32 %v1021_v14, %v516_v20  ;;  %v554_v48 = vmul.f32 %v1143_v22, %v516_v20  ;;  %v578_v49 = vmul.f32 %v898_v34, %v890_v50 }
  0x40   : > { %v902_v51 = vpop.eup %901  ;;  %v519_v25 = vmul.f32 %v900_v44, %v1103_v37  ;;  %v521_v42 = vmul.f32 %v1024_v15, %v517_v39  ;;  %v555_v52 = vmul.f32 %v822_v16, %v517_v39  ;;  %v579_v53 = vmul.f32 %v900_v44, %v892_v55 }
  0x41   : > { %v904_v54 = vpop.eup %903  ;;  %v522_v27 = vmul.f32 %v1029_v17, %v518_v45  ;;  %v556_v46 = vmul.f32 %v1148_v26, %v518_v45  ;;  %v580_v56 = vmul.f32 %v817_v7, %v576_v36  ;;  %v581_v57 = vmul.f32 %v818_v9, %v577_v40 }
  0x42   : > { %v906_v35 = vpop.eup %905  ;;  %v523_v14 = vmul.f32 %v1042_v23, %v519_v25  ;;  %v524_v58 = vadd.f32 %v521_v42, %v520_v47  ;;  %v557_v50 = vmul.f32 %v1151_v19, %v519_v25  ;;  %v558_v59 = vadd.f32 %v555_v52, %v554_v48 }
  0x43   : > { %v908_v5 = vpop.eup %907  ;;  %v582_v37 = vmul.f32 %v819_v3, %v578_v49  ;;  %v583_v15 = vmul.f32 %v1134_v4, %v579_v53  ;;  %v584_v6 = vadd.f32 %v581_v57, %v580_v56  ;;  %v424_v55 = vmul.f32 0.6931472, %v902_v51 }
  0x44   : > { %v525_v1 = vadd.f32 %v524_v58, %v522_v27  ;;  %v559_v8 = vadd.f32 %v558_v59, %v556_v46  ;;  %v426_v17 = vmul.f32 0.6931472, %v904_v54  ;;  %v428_v2 = vmul.f32 0.6931472, %v906_v35 }
  0x45   : > { %v585_v10 = vadd.f32 %v584_v6, %v582_v37  ;;  %v430_v7 = vmul.f32 0.6931472, %v908_v5  ;;  %v431_v9 = vadd.f32 %v424_v55, %v1052_v28  ;;  %v614_v23 = vmul.f32 %v1143_v22, %v576_v36 }
  0x46   : > { %v526_v11 = vadd.f32 %v525_v1, %v523_v14  ;;  %v560_v60 = vadd.f32 %v559_v8, %v557_v50  ;;  %v432_v12 = vadd.f32 %v426_v17, %v1055_v29  ;;  %v433_v3 = vadd.f32 %v428_v2, %v1058_v30 }
  0x47   : > { %v434_v62 = vadd.f32 %v430_v7, %v1061_v31  ;;  %v455_v0 = vsub.f32 %v431_v9, %v451_v32  ;;  %v615_v18 = vmul.f32 %v822_v16, %v577_v40  ;;  %v586_v24 = vadd.f32 %v585_v10, %v583_v15 }
  0x48   : > { %527 = vadd.xlane.f32.xlu0 %v526_v11  ;;  %561 = vadd.xlane.f32.xlu1 %v560_v60  ;;  %v456_v33 = vsub.f32 %v432_v12, %v452_v38  ;;  %v457_v20 = vsub.f32 %v433_v3, %v453_v41  ;;  %v616_v30 = vmul.f32 %v1148_v26, %v578_v49 }
  0x49   : > { %v458_v28 = vsub.f32 %v434_v62, %v454_v43  ;;  %v492_v36 = vmul.f32 %v1143_v22, %v455_v0  ;;  %v618_v4 = vadd.f32 %v615_v18, %v614_v23  ;;  %v617_v38 = vmul.f32 %v1151_v19, %v579_v53 }
  0x4a   : > { %v493_v34 = vmul.f32 %v822_v16, %v456_v33  ;;  %v494_v29 = vmul.f32 %v1148_v26, %v457_v20 }
  0x4b   : > { %v495_v31 = vmul.f32 %v1151_v19, %v458_v28  ;;  %v619_v39 = vadd.f32 %v618_v4, %v616_v30  ;;  %v496_v28 = vld [vmem:[%s1180_s7] sm:$0x1] }
  0x4c   : > { %587 = vadd.xlane.f32.xlu0 %v586_v24  ;;  %602 = vadd.xlane.f32.xlu1 %v601_v61  ;;  %v497_v32 = vadd.f32 %v493_v34, %v492_v36  ;;  %v825_v34 = vsel %vm513_vm2, 1.0, %v933_v13 }
  0x4d   : > { %v620_v16 = vadd.f32 %v619_v39, %v617_v38 }
  0x4e   : > { %v498_v21 = vadd.f32 %v497_v32, %v494_v29 }
  0x50   : > { %v499_v22 = vadd.f32 %v498_v21, %v495_v31  ;;  %v826_v31 = vsel %vm573_vm3, 1.0, %v933_v13 }
  0x52   : > { %500 = vadd.xlane.f32.xlu0 %v499_v22 }
  0x56   : > { %621 = vadd.xlane.f32.xlu0 %v620_v16  ;;  %v633_v16 = vld [vmem:[%s1189_s10] sm:$0x1] }
  0xa9   : > { %v543_v26 = vpop.xlane.xlu1 %542 }
  0xaa   : > { %v544_v43 = vrot.slane %v543_v26, 4 }
  0xac   : > { %v545_v25 = vadd.f32 %v544_v43, %v543_v26 }
  0xae   : > { %v546_v46 = vrot.slane %v545_v25, 2 }
  0xb0   : > { %v547_v15 = vadd.f32 %v546_v46, %v545_v25 }
  0xb2   : > { %v548_v9 = vrot.slane %v547_v15, 1 }
  0xb4   : > { %v549_v62 = vadd.f32 %v548_v9, %v547_v15 }
  0xd5   : > { %v528_v19 = vpop.xlane.xlu0 %527  ;;  %v562_v40 = vpop.xlane.xlu1 %561 }
  0xd6   : > { %v529_v41 = vrot.slane %v528_v19, 4  ;;  %v563_v44 = vrot.slane %v562_v40, 4 }
  0xd8   : > { %v530_v49 = vadd.f32 %v529_v41, %v528_v19  ;;  %v564_v42 = vadd.f32 %v563_v44, %v562_v40  ;;  %v637_v41 = vld [vmem:[%s1195_s13] sm:$0x1] }
  0xd9   : > { %v588_v45 = vpop.xlane.xlu0 %587  ;;  %v603_v47 = vpop.xlane.xlu1 %602 }
  0xda   : > { %v589_v48 = vrot.slane %v588_v45, 4  ;;  %v604_v51 = vrot.slane %v603_v47, 4  ;;  %v531_v53 = vrot.slane %v530_v49, 2  ;;  %v565_v57 = vrot.slane %v564_v42, 2 }
  0xdc   : > { %v590_v52 = vadd.f32 %v589_v48, %v588_v45  ;;  %v605_v54 = vadd.f32 %v604_v51, %v603_v47  ;;  %v532_v59 = vadd.f32 %v531_v53, %v530_v49  ;;  %v566_v6 = vadd.f32 %v565_v57, %v564_v42  ;;  %v640_v45 = vld [vmem:[%s1207_s16] sm:$0x1] }
  0xde   : > { %v591_v35 = vrot.slane %v590_v52, 2  ;;  %v606_v58 = vrot.slane %v605_v54, 2  ;;  %v533_v2 = vrot.slane %v532_v59, 1  ;;  %v567_v23 = vrot.slane %v566_v6, 1 }
  0xdf   : > { %v501_v27 = vpop.xlane.xlu0 %500 }
  0xe0   : > { %v502_v56 = vrot.slane %v501_v27, 4  ;;  %v592_v8 = vadd.f32 %v591_v35, %v590_v52  ;;  %v607_v17 = vadd.f32 %v606_v58, %v605_v54  ;;  %v534_v3 = vadd.f32 %v533_v2, %v532_v59 }
  0xe1   : > { %v568_v18 = vadd.f32 %v567_v23, %v566_v6 }
  0xe2   : > { %v503_v14 = vadd.f32 %v502_v56, %v501_v27  ;;  %v593_v12 = vrot.slane %v592_v8, 1  ;;  %v608_v61 = vrot.slane %v607_v17, 1 }
  0xe3   : > { %v622_v50 = vpop.xlane.xlu0 %621 }
  0xe4   : > { %v504_v5 = vrot.slane %v503_v14, 2  ;;  %v623_v37 = vrot.slane %v622_v50, 4  ;;  %v594_v24 = vadd.f32 %v593_v12, %v592_v8  ;;  %v609_v20 = vadd.f32 %v608_v61, %v607_v17 }
  0xe6   : > { %v624_v55 = vadd.f32 %v623_v37, %v622_v50  ;;  %v505_v1 = vadd.f32 %v504_v5, %v503_v14 }
  0xe8   : > { %v625_v10 = vrot.slane %v624_v55, 2  ;;  %v506_v7 = vrot.slane %v505_v1, 1 }
  0xea   : > { %v626_v11 = vadd.f32 %v625_v10, %v624_v55  ;;  %v507_v60 = vadd.f32 %v506_v7, %v505_v1 }
  0xec   : > { %830 = vpush %v507_v60  ;;  %v627_v0 = vrot.slane %v626_v11, 1 }
  0xed   : > { %832 = vpush %v534_v3 }
  0xee   : > { %834 = vpush %v549_v62  ;;  %v628_v33 = vadd.f32 %v627_v0, %v626_v11 }
  0xef   : > { %836 = vpush %v568_v18 }
  0xf0   : > { %838 = vpush %v594_v24 }
  0xf1   : > { %840 = vpush %v609_v20 }
  0xf2   : > { %842 = vpush %v628_v33 }
 0x11d   : > { %s831_s17 = spop %830 }
 0x11e   : > { %v509_v36 = vstv %s831_s17  ;;  %s833_s18 = spop %832 }
 0x11f   : > { %v510_v29 = vadd.f32 %v509_v36, %v496_v28  ;;  %v536_v30 = vstv %s833_s18  ;;  %s835_s22 = spop %834 }
 0x120   : > { %v551_v4 = vstv %s835_s22  ;;  %s837_s23 = spop %836  ;;  %v537_v32 = vmul.f32 %v825_v34, %v536_v30 }
 0x121   : > { %512 = vst.msk [vmem:[%s1180_s7] sm:$0x1] %vm306_vm0, %v510_v29  ;;  %s839_s24 = spop %838  ;;  %v552_v21 = vmul.f32 %v825_v34, %v551_v4  ;;  %v570_v63 = vstv %s837_s23 }
 0x122   : > { %v596_v38 = vstv %s839_s24  ;;  %s841_s25 = spop %840  ;;  %v571_v13 = vmul.f32 %v825_v34, %v570_v63 }
 0x123   : > { %v597_v39 = vmul.f32 %v826_v31, %v596_v38  ;;  %v611_v22 = vstv %s841_s25  ;;  %s843_s26 = spop %842 }
 0x124   : > { %v612_v26 = vmul.f32 %v826_v31, %v611_v22  ;;  %v630_v19 = vstv %s843_s26 }
 0x125   : > { %v598_v40 = vadd.f32 %v597_v39, %v537_v32  ;;  %v631_v43 = vmul.f32 %v826_v31, %v630_v19 }
 0x126   : > { %v613_v44 = vadd.f32 %v612_v26, %v552_v21 }
 0x127   : > { %v634_v47 = vadd.f32 %v633_v16, %v598_v40  ;;  %v632_v48 = vadd.f32 %v631_v43, %v571_v13 }
 0x128   : > { %v638_v49 = vadd.f32 %v637_v41, %v613_v44 }
 0x129   : > { %636 = vst.msk [vmem:[%s1189_s10] sm:$0x1] %vm308_vm1, %v634_v47  ;;  %v641_v51 = vadd.f32 %v640_v45, %v632_v48 }
 0x12a   : > { %639 = vst.msk [vmem:[%s1195_s13] sm:$0x1] %vm308_vm1, %v638_v49 }
 0x12b   : > { %642 = vst.msk [vmem:[%s1207_s16] sm:$0x1] %vm308_vm1, %v641_v51 }
 0x12c PF: > { %s16_s20 = sadd.s32 1, %s931_s20   ;;  %s1243_s18 = smov %s927_s19 }
 0x12d   : > { %p13_p5 = scmp.ge.s32.totalorder %s16_s20, 4   ;;  %s1244_s19 = smov %s1246_s21 }
 0x12f   :  { %15 = sbr.rel (!%p13_p5) target bundleno = 2 (0x2), region = 103 }

</bundles_post_ra>
